<compile_context>
chip_gen: v5e
topology: v5e:2x2
jax: 0.10.0
libtpu: 0.0.40
codegen_flags: <defaults>
</compile_context>

<pallas_src>
import jax
import jax.numpy as jnp
from jax.experimental import pallas as pl
from jax.experimental.pallas import tpu as pltpu


def _round_up(x, m):
    return ((x + m - 1) // m) * m


def _vmem_estimate_bytes(tb, d, x_bytes):
    """Rough VMEM footprint for one grid step (double-buffered pipeline)."""
    est = 2 * tb * d * x_bytes          # x tile, double-buffered
    est += 2 * d * d * 2                # w1 (bf16), double-buffered
    est += 2 * 2 * d * 4                # b1, w2 rows
    est += 2 * tb * 4                   # output tile
    est += tb * d * 4                   # f32 h intermediate / working set
    return est


def _head_kernel(x_ref, w1_ref, b1_ref, w2_ref, b2_ref, o_ref):
    # Dropout is identity in eval mode (inference semantics).
    # TODO(synk): training-mode stochastic dropout not implemented.
    x = x_ref[...]                                     # (TB, D)
    if x.dtype != jnp.bfloat16:
        x = x.astype(jnp.bfloat16)                     # MXU operand dtype

    # dense: x @ W1 with W1 already in (in, out) layout -> native MXU matmul,
    # f32 accumulation.
    h = jnp.dot(x, w1_ref[...], preferred_element_type=jnp.float32)  # (TB, D)

    h = jnp.tanh(h + b1_ref[...])                      # bias + tanh in f32 (EUP)

    # out_proj (N=1): VPU multiply + lane reduction instead of a 1-column MXU
    # matmul; bias added from SMEM scalar.
    out = jnp.sum(h * w2_ref[...], axis=-1, keepdims=True) + b2_ref[0, 0]
    o_ref[...] = out.astype(o_ref.dtype)


def roberta_classification_head(features, w_dense, b_dense, w_out, b_out,
                                *, block_b=2048):
    """features: (B, D) f32 or bf16
    w_dense: (D, D) torch-style (out, in); b_dense: (D,)
    w_out:   (1, D) torch-style (out, in); b_out:   (1,)
    returns: (B, 1) in features.dtype
    """
    B, D = features.shape
    out_dtype = features.dtype
    x_bytes = jnp.dtype(features.dtype).itemsize

    # --- batch tile selection -------------------------------------------------
    # Multiple of 8 (f32 sublanes); at most ceil(B/2) so the grid has >=2 tiles
    # whenever B > 8 (lets v7x shard across both TensorCores).
    TB = min(block_b, _round_up(pl.cdiv(B, 2), 8))
    TB = max(TB, 8)
    # Respect a conservative VMEM budget (v7x: 64 MiB physical per TC).
    vmem_budget = 44 << 20
    while _vmem_estimate_bytes(TB, D, x_bytes) > vmem_budget and TB > 8:
        TB = max(8, _round_up(TB // 2, 8))

    B_pad = _round_up(B, TB)
    x = features
    if B_pad != B:
        x = jnp.pad(x, ((0, B_pad - B), (0, 0)))

    # --- parameter prep (one-time; constant-folded under jit) ----------------
    # Pre-transpose to (in, out) so the kernel matmul is a plain MXU dot with
    # no in-kernel relayout of the (D, D) weight.
    w1 = w_dense.T.astype(jnp.bfloat16)                # (D, D) (in, out)
    b1 = b_dense.reshape(1, D).astype(jnp.float32)     # (1, D) lane-dense row
    w2 = w_out.reshape(1, D).astype(jnp.float32)       # (1, D) lane-dense row
    b2 = b_out.reshape(1, 1).astype(jnp.float32)       # SMEM scalar

    grid = (B_pad // TB,)

    # Explicit scoped-VMEM limit: large TB would exceed v5e's 16 MiB default.
    vmem_limit = min(int(_vmem_estimate_bytes(TB, D, x_bytes) * 1.5) + (2 << 20),
                     56 << 20)

    cost = pl.CostEstimate(
        flops=2 * B_pad * D * D + 3 * B_pad * D,
        transcendentals=B_pad * D,
        bytes_accessed=(B_pad * D * x_bytes            # x
                        + D * D * 2                    # w1 (bf16)
                        + 2 * D * 4                    # b1, w2
                        + B_pad * 4))                  # out

    out = pl.pallas_call(
        _head_kernel,
        out_shape=jax.ShapeDtypeStruct((B_pad, 1), out_dtype),
        grid=grid,
        in_specs=[
            pl.BlockSpec((TB, D), lambda i: (i, 0)),               # x: batch-tiled
            pl.BlockSpec((D, D), lambda i: (0, 0)),                # w1: VMEM-resident
            pl.BlockSpec((1, D), lambda i: (0, 0)),                # b1: VMEM-resident
            pl.BlockSpec((1, D), lambda i: (0, 0)),                # w2: VMEM-resident
            pl.BlockSpec(memory_space=pltpu.MemorySpace.SMEM),     # b2: SMEM scalar
        ],
        out_specs=pl.BlockSpec((TB, 1), lambda i: (i, 0)),
        compiler_params=pltpu.CompilerParams(
            dimension_semantics=("parallel",),
            vmem_limit_bytes=vmem_limit),
        cost_estimate=cost,
    )(x, w1, b1, w2, b2)

    return out[:B]


if __name__ == "__main__":
    key = jax.random.PRNGKey(0)
    k_x, k_w1, k_b1, k_w2, k_b2 = jax.random.split(key, 5)

    # Small synthetic config; batch not a multiple of the tile to exercise the
    # padding path, and B > 8 so the >=2-tile (multi-TC) path is taken.
    batch, d_model = 20, 256
    features = jax.random.normal(k_x, (batch, d_model), dtype=jnp.float32)

    # Deterministic synthetic parameters (shapes from nn.Linear in __init__).
    w_dense = jax.random.normal(k_w1, (d_model, d_model), jnp.float32) * 0.05
    b_dense = jax.random.normal(k_b1, (d_model,), jnp.float32) * 0.05
    w_out = jax.random.normal(k_w2, (1, d_model), jnp.float32) * 0.05
    b_out = jax.random.normal(k_b2, (1,), jnp.float32) * 0.05

    # f32 activation path.
    out = roberta_classification_head(features, w_dense, b_dense, w_out, b_out)
    out = jax.block_until_ready(out)

    # Reference in plain JAX (eval-mode dropout == identity).  Tolerance
    # loosened because the dense matmul operands are bf16 in-kernel.
    ref = jnp.tanh(features @ w_dense.T + b_dense) @ w_out.T + b_out
    assert out.shape == (batch, 1)
    assert jnp.allclose(out, ref, atol=3e-2, rtol=3e-2), float(
        jnp.max(jnp.abs(out - ref)))

    # bf16 activation-streaming path (halves the dominant HBM stream on v6e).
    feats_bf16 = features.astype(jnp.bfloat16)
    out_bf16 = roberta_classification_head(feats_bf16, w_dense, b_dense,
                                           w_out, b_out)
    out_bf16 = jax.block_until_ready(out_bf16)
    assert out_bf16.shape == (batch, 1)
    assert jnp.allclose(out_bf16.astype(jnp.float32), ref,
                        atol=1e-1, rtol=1e-1), float(
        jnp.max(jnp.abs(out_bf16.astype(jnp.float32) - ref)))

    print("KERNEL_OK")
</pallas_src>

<mosaic_0001>
module attributes {stable_mosaic.version = 11 : i64} {
  func.func @_head_kernel(%arg0: i32, %arg1: memref<16x256xf32, #tpu.memory_space<vmem>>, %arg2: memref<256x256xbf16, #tpu.memory_space<vmem>>, %arg3: memref<1x256xf32, #tpu.memory_space<vmem>>, %arg4: memref<1x256xf32, #tpu.memory_space<vmem>>, %arg5: memref<1x1xf32, #tpu.memory_space<smem>>, %arg6: memref<16x1xf32, #tpu.memory_space<vmem>>) attributes {dimension_semantics = [#tpu.dimension_semantics<parallel>], iteration_bounds = array<i64: 2>, scalar_prefetch = 0 : i64, scratch_operands = 0 : i64, tpu.core_type = #tpu.core_type<tc>, window_params = [{transform_indices = @transform_0, window_bounds = array<i64: 16, 256>}, {pipeline_mode = #tpu.pipeline_mode<synchronous>, transform_indices = @transform_1, window_bounds = array<i64: 256, 256>}, {pipeline_mode = #tpu.pipeline_mode<synchronous>, transform_indices = @transform_2, window_bounds = array<i64: 1, 256>}, {pipeline_mode = #tpu.pipeline_mode<synchronous>, transform_indices = @transform_3, window_bounds = array<i64: 1, 256>}, {transform_indices = @transform_4, window_bounds = array<i64: 1, 1>}, {transform_indices = @transform_5, window_bounds = array<i64: 16, 1>}]} {
    %c0 = arith.constant 0 : index
    %c0_0 = arith.constant 0 : index
    %0 = vector.load %arg1[%c0, %c0_0] : memref<16x256xf32, #tpu.memory_space<vmem>>, vector<16x256xf32>
    %1 = arith.truncf %0 : vector<16x256xf32> to vector<16x256xbf16>
    %c0_1 = arith.constant 0 : index
    %c0_2 = arith.constant 0 : index
    %2 = vector.load %arg2[%c0_1, %c0_2] : memref<256x256xbf16, #tpu.memory_space<vmem>>, vector<256x256xbf16>
    %cst = arith.constant dense<0.000000e+00> : vector<16x256xf32>
    %3 = tpu.matmul %1, %2, %cst {dimension_numbers = #tpu.dot_dimension_numbers<[1], [0], [0], [1], [0, 0, 1, 1], [], []>} : vector<16x256xbf16>, vector<256x256xbf16>, vector<16x256xf32> -> vector<16x256xf32>
    %c0_3 = arith.constant 0 : index
    %c0_4 = arith.constant 0 : index
    %4 = vector.load %arg3[%c0_3, %c0_4] : memref<1x256xf32, #tpu.memory_space<vmem>>, vector<1x256xf32>
    %5 = vector.broadcast %4 : vector<1x256xf32> to vector<16x256xf32>
    %6 = arith.addf %3, %5 : vector<16x256xf32>
    %7 = math.tanh %6 : vector<16x256xf32>
    %c0_5 = arith.constant 0 : index
    %c0_6 = arith.constant 0 : index
    %8 = vector.load %arg4[%c0_5, %c0_6] : memref<1x256xf32, #tpu.memory_space<vmem>>, vector<1x256xf32>
    %9 = vector.broadcast %8 : vector<1x256xf32> to vector<16x256xf32>
    %10 = arith.mulf %7, %9 : vector<16x256xf32>
    %cst_7 = arith.constant dense<0.000000e+00> : vector<16xf32>
    %11 = vector.multi_reduction <add>, %10, %cst_7 [1] : vector<16x256xf32> to vector<16xf32>
    %12 = vector.shape_cast %11 : vector<16xf32> to vector<16x1xf32>
    %c0_8 = arith.constant 0 : index
    %c0_9 = arith.constant 0 : index
    %13 = memref.load %arg5[%c0_8, %c0_9] : memref<1x1xf32, #tpu.memory_space<smem>>
    %14 = vector.broadcast %13 : f32 to vector<16x1xf32>
    %15 = arith.addf %12, %14 : vector<16x1xf32>
    %c0_10 = arith.constant 0 : index
    %c0_11 = arith.constant 0 : index
    %16 = vector.load %arg6[%c0_10, %c0_11] : memref<16x1xf32, #tpu.memory_space<vmem>>, vector<16x1xf32>
    tpu.vector_store %arg6[%c0_10, %c0_11], %15 {strides = array<i32>} : memref<16x1xf32, #tpu.memory_space<vmem>>, vector<16x1xf32>,
    return
  }
  func.func @transform_0(%arg0: i32) -> (i32, i32) {
    %c0_i32 = arith.constant 0 : i32
    %c0_i32_0 = arith.constant 0 : i32
    return %arg0, %c0_i32 : i32, i32
  }
  func.func @transform_1(%arg0: i32) -> (i32, i32) {
    %c0_i32 = arith.constant 0 : i32
    %c0_i32_0 = arith.constant 0 : i32
    %c0_i32_1 = arith.constant 0 : i32
    return %c0_i32, %c0_i32_0 : i32, i32
  }
  func.func @transform_2(%arg0: i32) -> (i32, i32) {
    %c0_i32 = arith.constant 0 : i32
    %c0_i32_0 = arith.constant 0 : i32
    %c0_i32_1 = arith.constant 0 : i32
    return %c0_i32, %c0_i32_0 : i32, i32
  }
  func.func @transform_3(%arg0: i32) -> (i32, i32) {
    %c0_i32 = arith.constant 0 : i32
    %c0_i32_0 = arith.constant 0 : i32
    %c0_i32_1 = arith.constant 0 : i32
    return %c0_i32, %c0_i32_0 : i32, i32
  }
  func.func @transform_4(%arg0: i32) -> (i32, i32) {
    %c0_i32 = arith.constant 0 : i32
    %c0_i32_0 = arith.constant 0 : i32
    %c0_i32_1 = arith.constant 0 : i32
    return %c0_i32, %c0_i32_0 : i32, i32
  }
  func.func @transform_5(%arg0: i32) -> (i32, i32) {
    %c0_i32 = arith.constant 0 : i32
    %c0_i32_0 = arith.constant 0 : i32
    return %arg0, %c0_i32 : i32, i32
  }
}

</mosaic_0001>

<bundles_post_ra>
// kernel: tpu_custom_call.1
= control target key start
LH: loop header
LB: loop body
LE: loop exit
PB: predicated region body
PF: predicated region fallthrough
CT: control target
= control target key end

     0   :  { %s1128_s0 = inlined_call_operand.hbm [shape: f32[32,256], index: 0, kind: input, shape index: {}]   ;;  %s1129_s1 = inlined_call_operand.hbm [shape: bf16[256,256], index: 1, kind: input, shape index: {}]   ;;  %s1130_s2 = inlined_call_operand.vmem [shape: f32[1,256], index: 2, kind: input, shape index: {}]   ;;  %s1131_s3 = inlined_call_operand.vmem [shape: f32[1,256], index: 3, kind: input, shape index: {}]   ;;  %s1132_s4 = inlined_call_operand.<no memory space> [shape: f32[1,1], index: 4, kind: input, shape index: {}]   ;;  %s1133_s5 = inlined_call_operand.vmem [shape: f32[32,1], index: 5, kind: output, shape index: {}]  }
   0x1   :  { %10 = sst [smem:[#allocation2]] %s1132_s4 }
   0x2   :  { %11 = vsyncpa [#allocation4], 0 }
   0x3   :  { %13 = vsyncpa [#allocation4 + $0x1], 0 }
   0x4   :  { %14 = vsyncpa [#allocation6], 0  ;;  %s1010_s20 = smov 0   ;;  %s1012_s21 = smov 0  }
   0x5   :  { %s1014_s22 = smov 0   ;;  %s1016_s23 = smov 0  }
   0x6 LB: > { %s632_s4 = sadd.s32 4294967295, %s970_s23   ;;  %p40_p0 = scmp.ne.s32.totalorder %s962_s21, %s958_s20  ;;  %s970_s23 = sphi %s1016_s23, %s1141_s23   ;;  %s966_s22 = sphi %s1014_s22, %s1140_s22   ;;  %s962_s21 = sphi %s1012_s21, %s1139_s21   ;;  %s958_s20 = sphi %s1010_s20, %s1138_s20  }
   0x7   : > { %p1032_p1 = scmp.eq.s32.totalorder %s632_s4, 0  ;;  %p634_p2 = scmp.ge.s32.totalorder %s970_s23, 1 }
   0x8   : > { %p161_p3 = scmp.lt.s32.totalorder %s970_s23, 3  ;;  %s172_s28 = sshll.u32 %s1129_s1, 4  ;;  %s173_s28 = int_to_ptr.hbm [resolvable:$true] %s172_s28 }
   0x9   : > { %p1040_p4 = por %p1032_p1, %p40_p0  ;;  %s972_s30 = smov [#allocation5]  }
   0xa   : > { %p1047_p5 = pnand %p634_p2, %p161_p3  ;;  %s174_s6 = sshll.u32 %s972_s30, 4  ;;  %s175_s6 = int_to_ptr.vmem [resolvable:$true] %s174_s6 }
   0xb   : > { %s1056_s7 = sadd.s32 1, %s970_s23   ;;  %s973_s8 = smov 128  }
   0xc   : > { %p816_p6 = pneg %p1047_p5  ;;  %s974_s9 = smov 8  }
   0xd   : > { %s24_s10 = ssub.s32 %s970_s23, %s1056_s7  ;;  %s27_s11 = sadd.s32 1, %s966_s22 }
   0xe   : > { %p817_p7 = pnand %p816_p6, %p1032_p1  ;;  %p25_p8 = scmp.eq.s32.totalorder %s24_s10, 0 }
   0xf   : > { %p34_p9 = scmp.ne.s32.totalorder %s966_s22, %s962_s21  ;;  %p35_p10 = scmp.eq.s32.totalorder %s970_s23, 0 }
  0x10   : > { %819 = dma.hbm_to_vmem [thread:$0]  (!%p817_p7), %s173_s28, 4096, %s175_s6, [#allocation6], %s973_s8, %s973_s8, %s974_s9  }
  0x11   : > { %p825_p11 = scmp.lt.s32.totalorder %s970_s23, 2  ;;  %p36_p12 = por %p35_p10, %p34_p9 }
  0x12   : > { %s1066_s12 = scalar_select %p25_p8, %s966_s22, %s27_s11  }
  0x13   : > { %s197_s13 = sand.u32 1, %s966_s22   ;;  %s777_s15 = sshll.u32 %s970_s23, 5 }
  0x14   : > { %s637_s14 = sshll.u32 %s197_s13, 5  ;;  %s207_s18 = scalar_lea.hbm %s1128_s0, %s777_s15 }
  0x15   : > { %s201_s19 = scalar_lea.vmem [#allocation3], %s637_s14  ;;  %s208_s26 = sshll.u32 %s207_s18, 4  ;;  %s209_s26 = int_to_ptr.hbm [resolvable:$true] %s208_s26 }
  0x16   : > { %s210_s20 = sshll.u32 %s201_s19, 4  ;;  %p1073_p13 = pnand %p825_p11, %p36_p12  ;;  %s211_s20 = int_to_ptr.vmem [resolvable:$true] %s210_s20 }
  0x17   : > { %s198_s28 = scalar_lea.sflag [#allocation4], %s197_s13  ;;  %s902_s30 = sshra.s32 %s209_s26, 4  ;;  %s903_s30 = int_to_ptr.hbm [resolvable:$true] %s902_s30 }
  0x18   : > { %s904_s6 = scalar_lea.hbm %s903_s30, 32  ;;  %p906_p2 = pneg %p1073_p13 }
  0x19   : > { %p905_p0 = scmp.ne.s32.totalorder %s903_s30, %s904_s6  ;;  %s909_s10 = scalar_lea.hbm %s1128_s0, 64 }
  0x1a   : > { %p910_p7 = scmp.lt.s32.totalorder %s903_s30, %s1128_s0  ;;  %p911_p8 = scmp.lt.s32.totalorder %s909_s10, %s904_s6 }
  0x1b   : > { %p907_p3 = pnand %p906_p2, %p905_p0 }
  0x1c   : > { %p912_p9 = por %p911_p8, %p910_p7 }
  0x1d   : > { %p908_p6 = pneg %p907_p3 }
  0x1f   : > { %p913_p10 = pnand %p912_p9, %p908_p6 }
  0x21   : > { %916 = shalt.err (!%p913_p10)
}
  0x22   : > { %s975_s13 = smov 256   ;;  %s976_s15 = smov 16  }
  0x23   : > { %823 = dma.hbm_to_vmem [thread:$0]  (!%p1073_p13), %s209_s26, 512, %s211_s20, %s198_s28, %s975_s13, %s975_s13, %s976_s15  }
  0x24   : > { %222 = sbr.rel (%p1047_p5) target bundleno = 354 (0x162), region = 40  ;;  %s224_s16 = sand.u32 (!%p1047_p5), 1, %s962_s21  }
  0x25   : > { %s642_s17 = sshll.u32 (!%p1047_p5), %s224_s16, 5  ;;  %s225_s18 = scalar_lea.sflag (!%p1047_p5), [#allocation4], %s224_s16 }
  0x26   : > { %s1090_s19 = scalar_lea.vmem (!%p1047_p5), [#allocation3], %s642_s17 }
  0x29   : > { %949 = dma.done.wait (%p1040_p4), %s225_s18, 512  }
  0x2a   : > { %951 = vsyncadd (%p1040_p4), %s225_s18, 4294966784 }
  0x2b   : > { %953 = dma.done.wait (%p1032_p1), [#allocation6], 4096  }
  0x2c   : > { %955 = vsyncadd (%p1032_p1), [#allocation6], 4294963200  ;;  %v704_v0 = vld [vmem:[#allocation5 + $0x70] sm:$0xf]  ;;  %v793_v1 = vld [vmem:[#allocation5 + $0x74] sm:$0xf0] }
  0x2d   : > { %v768_v2 = vld [vmem:[#allocation5 + $0xf0] sm:$0xf]  ;;  %v705_v3 = vor.u32 %v793_v1, %v704_v0  ;;  %v809_v4 = vld [vmem:[#allocation5 + $0xf4] sm:$0xf0]  ;;  %v792_v5 = vld [vmem:[#allocation5 + $0x74] sm:$0xf] }
  0x2e   : > { %v706_v6 = vld [vmem:[#allocation5 + $0x78] sm:$0xf0]  ;;  %v769_v7 = vor.u32 %v809_v4, %v768_v2  ;;  %v808_v9 = vld [vmem:[#allocation5 + $0xf4] sm:$0xf]  ;;  %v696_v11 = vld [vmem:[#allocation5 + $0x60] sm:$0xf] }
  0x2f   : > { %v709_v8 = vor.u32 %v792_v5, %v706_v6  ;;  %v770_v10 = vld [vmem:[#allocation5 + $0xf8] sm:$0xf0]  ;;  %472 = vmatpush.bf16.msra.mxu0 %v705_v3  ;;  %v791_v13 = vld [vmem:[#allocation5 + $0x64] sm:$0xf0]  ;;  %v760_v14 = vld [vmem:[#allocation5 + $0xe0] sm:$0xf] }
  0x30   : > { %v773_v12 = vor.u32 %v808_v9, %v770_v10  ;;  %v807_v15 = vld [vmem:[#allocation5 + $0xe4] sm:$0xf0]  ;;  %486 = vmatpush.bf16.msra.mxu1 %v769_v7  ;;  %v697_v16 = vor.u32 %v791_v13, %v696_v11  ;;  %v790_v18 = vld [vmem:[#allocation5 + $0x64] sm:$0xf]  ;;  %v698_v19 = vld [vmem:[#allocation5 + $0x68] sm:$0xf0] }
  0x31   : > { %500 = vmatpush.bf16.msra.mxu2 %v709_v8  ;;  %v761_v17 = vor.u32 %v807_v15, %v760_v14  ;;  %v806_v20 = vld [vmem:[#allocation5 + $0xe4] sm:$0xf]  ;;  %v701_v21 = vor.u32 %v790_v18, %v698_v19  ;;  %v762_v22 = vld [vmem:[#allocation5 + $0xe8] sm:$0xf0]  ;;  %v688_v23 = vld [vmem:[#allocation5 + $0x50] sm:$0xf] }
  0x32   : > { %514 = vmatpush.bf16.msra.mxu3 %v773_v12  ;;  %v789_v24 = vld [vmem:[#allocation5 + $0x54] sm:$0xf0]  ;;  %v765_v25 = vor.u32 %v806_v20, %v762_v22  ;;  %v752_v26 = vld [vmem:[#allocation5 + $0xd0] sm:$0xf]  ;;  %v788_v28 = vld [vmem:[#allocation5 + $0x54] sm:$0xf] }
  0x33   : > { %v805_v27 = vld [vmem:[#allocation5 + $0xd4] sm:$0xf0]  ;;  %473 = vmatpush.bf16.msra.mxu0 %v697_v16  ;;  %v689_v29 = vor.u32 %v789_v24, %v688_v23  ;;  %v690_v30 = vld [vmem:[#allocation5 + $0x58] sm:$0xf0]  ;;  %v804_v31 = vld [vmem:[#allocation5 + $0xd4] sm:$0xf] }
  0x34   : > { %v754_v32 = vld [vmem:[#allocation5 + $0xd8] sm:$0xf0]  ;;  %487 = vmatpush.bf16.msra.mxu1 %v761_v17  ;;  %v753_v33 = vor.u32 %v805_v27, %v752_v26  ;;  %v693_v34 = vor.u32 %v788_v28, %v690_v30  ;;  %v680_v35 = vld [vmem:[#allocation5 + $0x40] sm:$0xf]  ;;  %v787_v36 = vld [vmem:[#allocation5 + $0x44] sm:$0xf0] }
  0x35   : > { %501 = vmatpush.bf16.msra.mxu2 %v701_v21  ;;  %v744_v37 = vld [vmem:[#allocation5 + $0xc0] sm:$0xf]  ;;  %v757_v38 = vor.u32 %v804_v31, %v754_v32  ;;  %v803_v39 = vld [vmem:[#allocation5 + $0xc4] sm:$0xf0]  ;;  %v786_v40 = vld [vmem:[#allocation5 + $0x44] sm:$0xf]  ;;  %v681_v44 = vor.u32 %v787_v36, %v680_v35 }
  0x36   : > { %515 = vmatpush.bf16.msra.mxu3 %v765_v25  ;;  %v682_v41 = vld [vmem:[#allocation5 + $0x48] sm:$0xf0]  ;;  %v802_v42 = vld [vmem:[#allocation5 + $0xc4] sm:$0xf]  ;;  %v745_v45 = vor.u32 %v803_v39, %v744_v37  ;;  %v672_v47 = vld [vmem:[#allocation5 + $0x30] sm:$0xf] }
  0x37   : > { %v746_v43 = vld [vmem:[#allocation5 + $0xc8] sm:$0xf0]  ;;  %474 = vmatpush.bf16.msra.mxu0 %v689_v29  ;;  %v685_v46 = vor.u32 %v786_v40, %v682_v41  ;;  %v785_v48 = vld [vmem:[#allocation5 + $0x34] sm:$0xf0]  ;;  %v736_v49 = vld [vmem:[#allocation5 + $0xb0] sm:$0xf] }
  0x38   : > { %488 = vmatpush.bf16.msra.mxu1 %v753_v33  ;;  %v749_v50 = vor.u32 %v802_v42, %v746_v43  ;;  %v801_v51 = vld [vmem:[#allocation5 + $0xb4] sm:$0xf0]  ;;  %v784_v52 = vld [vmem:[#allocation5 + $0x34] sm:$0xf]  ;;  %v674_v53 = vld [vmem:[#allocation5 + $0x38] sm:$0xf0]  ;;  %v673_v56 = vor.u32 %v785_v48, %v672_v47 }
  0x39   : > { %502 = vmatpush.bf16.msra.mxu2 %v693_v34  ;;  %v800_v54 = vld [vmem:[#allocation5 + $0xb4] sm:$0xf]  ;;  %v738_v55 = vld [vmem:[#allocation5 + $0xb8] sm:$0xf0]  ;;  %v737_v57 = vor.u32 %v801_v51, %v736_v49  ;;  %v677_v58 = vor.u32 %v784_v52, %v674_v53  ;;  %v664_v59 = vld [vmem:[#allocation5 + $0x20] sm:$0xf] }
  0x3a   : > { %516 = vmatpush.bf16.msra.mxu3 %v757_v38  ;;  %v783_v60 = vld [vmem:[#allocation5 + $0x24] sm:$0xf0]  ;;  %v728_v61 = vld [vmem:[#allocation5 + $0xa0] sm:$0xf]  ;;  %v741_v62 = vor.u32 %v800_v54, %v738_v55  ;;  %v782_v0 = vld [vmem:[#allocation5 + $0x24] sm:$0xf] }
  0x3b   : > { %475 = vmatpush.bf16.msra.mxu0 %v681_v44  ;;  %v799_v63 = vld [vmem:[#allocation5 + $0xa4] sm:$0xf0]  ;;  %v666_v1 = vld [vmem:[#allocation5 + $0x28] sm:$0xf0]  ;;  %v798_v2 = vld [vmem:[#allocation5 + $0xa4] sm:$0xf]  ;;  %v665_v4 = vor.u32 %v783_v60, %v664_v59 }
  0x3c   : > { %489 = vmatpush.bf16.msra.mxu1 %v745_v45  ;;  %v730_v3 = vld [vmem:[#allocation5 + $0xa8] sm:$0xf0]  ;;  %v729_v5 = vor.u32 %v799_v63, %v728_v61  ;;  %v669_v6 = vor.u32 %v782_v0, %v666_v1  ;;  %v656_v7 = vld [vmem:[#allocation5 + $0x10] sm:$0xf]  ;;  %v781_v8 = vld [vmem:[#allocation5 + $0x14] sm:$0xf0] }
  0x3d   : > { %503 = vmatpush.bf16.msra.mxu2 %v685_v46  ;;  %v720_v9 = vld [vmem:[#allocation5 + $0x90] sm:$0xf]  ;;  %v733_v10 = vor.u32 %v798_v2, %v730_v3  ;;  %v797_v11 = vld [vmem:[#allocation5 + $0x94] sm:$0xf0]  ;;  %v780_v12 = vld [vmem:[#allocation5 + $0x14] sm:$0xf]  ;;  %v657_v16 = vor.u32 %v781_v8, %v656_v7 }
  0x3e   : > { %517 = vmatpush.bf16.msra.mxu3 %v749_v50  ;;  %v658_v13 = vld [vmem:[#allocation5 + $0x18] sm:$0xf0]  ;;  %v796_v14 = vld [vmem:[#allocation5 + $0x94] sm:$0xf]  ;;  %v721_v17 = vor.u32 %v797_v11, %v720_v9  ;;  %v648_v19 = vld [vmem:[#allocation5] sm:$0xf] }
  0x3f   : > { %476 = vmatpush.bf16.msra.mxu0 %v673_v56  ;;  %v722_v15 = vld [vmem:[#allocation5 + $0x98] sm:$0xf0]  ;;  %v661_v18 = vor.u32 %v780_v12, %v658_v13  ;;  %v779_v20 = vld [vmem:[#allocation5 + $0x4] sm:$0xf0]  ;;  %v712_v21 = vld [vmem:[#allocation5 + $0x80] sm:$0xf] }
  0x40   : > { %490 = vmatpush.bf16.msra.mxu1 %v737_v57  ;;  %v725_v22 = vor.u32 %v796_v14, %v722_v15  ;;  %v795_v23 = vld [vmem:[#allocation5 + $0x84] sm:$0xf0]  ;;  %v778_v24 = vld [vmem:[#allocation5 + $0x4] sm:$0xf]  ;;  %v650_v25 = vld [vmem:[#allocation5 + $0x8] sm:$0xf0]  ;;  %v649_v28 = vor.u32 %v779_v20, %v648_v19 }
  0x41   : > { %504 = vmatpush.bf16.msra.mxu2 %v677_v58  ;;  %v794_v26 = vld [vmem:[#allocation5 + $0x84] sm:$0xf]  ;;  %v714_v27 = vld [vmem:[#allocation5 + $0x88] sm:$0xf0]  ;;  %v270_v30 = vld [vmem:[%s1090_s19 + $0x10] sm:$0xff]  ;;  %v713_v31 = vor.u32 %v795_v23, %v712_v21  ;;  %v653_v32 = vor.u32 %v778_v24, %v650_v25  ;;  %s644_s26 = sshll.u32 %s632_s4, 1 }
  0x42   : > { %518 = vmatpush.bf16.msra.mxu3 %v741_v62  ;;  %v268_v29 = vld [vmem:[%s1090_s19] sm:$0xff]  ;;  %v269_v33 = vld [vmem:[%s1090_s19 + $0x8] sm:$0xff]  ;;  %v271_v34 = vld [vmem:[%s1090_s19 + $0x18] sm:$0xff]  ;;  %v717_v35 = vor.u32 %v794_v26, %v714_v27  ;;  %p263_p1 = scmp.lt.s32.totalorder %s644_s26, 3  ;;  %s548_s27 = sld [smem:[#allocation2]]  ;;  %vm552_vm0 = vcmask 7168  }
  0x43   : > { %477 = vmatpush.bf16.msra.mxu0 %v665_v4  ;;  %v272_v36 = vpack.c.bf16 %v270_v30, %v268_v29  ;;  %v273_v37 = vpack.c.bf16 %v271_v34, %v269_v33  ;;  %v306_v38 = vld [vmem:[%s1130_s2] sm:$0x3] }
  0x44   : > { %491 = vmatpush.bf16.msra.mxu1 %v729_v5  ;;  %v308_v39 = vperm.slane %v306_v38, 0  ;;  %v309_v44 = vperm.slane %v306_v38, 1  ;;  %v532_v51 = vld [vmem:[%s1131_s3] sm:$0x3]  ;;  %s1143_s26 = smov (!%p263_p1, %s644_s26), 3 }
  0x45   : > { %505 = vmatpush.bf16.msra.mxu2 %v669_v6  ;;  %v534_v53 = vperm.slane %v532_v51, 0  ;;  %v535_v57 = vperm.slane %v532_v51, 1  ;;  %s645_s28 = sshll.u32 %s1143_s26, 3 }
  0x46   : > { %519 = vmatpush.bf16.msra.mxu3 %v733_v10  ;;  %s266_s8 = scalar_lea.vmem %s1133_s5, %s645_s28 }
  0x47   : > { %478 = vmatpush.bf16.msra.mxu0 %v657_v16 }
  0x48   : > { %492 = vmatpush.bf16.msra.mxu1 %v721_v17  ;;  %v549_v6 = vstv %s548_s27 }
  0x49   : > { %506 = vmatpush.bf16.msra.mxu2 %v661_v18 }
  0x4a   : > { %520 = vmatpush.bf16.msra.mxu3 %v725_v22 }
  0x4b   : > { %479 = vmatpush.bf16.msra.mxu0 %v649_v28 }
  0x4c   : > { %493 = vmatpush.bf16.msra.mxu1 %v713_v31 }
  0x4d   : > { %507 = vmatpush.bf16.msra.mxu2 %v653_v32 }
  0x4e   : > { %521 = vmatpush.bf16.msra.mxu3 %v717_v35  ;;  %480 = vmatmul.bf16.vlgmr.msra.gmra.mxu0 %v272_v36 }
  0x4f   : > { %494 = vmatmul.bf16.vlgmr.msra.gmra.mxu1 %v273_v37 }
  0x50   : > { %508 = vmatmul.bf16.vlgmr.msra.gmra.mxu2 %v272_v36 }
  0x51   : > { %522 = vmatmul.bf16.vlgmr.msra.gmra.mxu3 %v273_v37 }
  0xcb   : > { %v481_v40 = vpop.f32.mrf.mxu0 }
  0xcc   : > { %v482_v41 = vadd.f32 %v481_v40, %v308_v39  ;;  %v495_v42 = vpop.f32.mrf.mxu1 }
  0xce   : > { %v496_v43 = vadd.f32 %v495_v42, %v482_v41 }
  0xd0   : > { %864 = vtanh.f32 %v496_v43 }
  0xd3   : > { %v509_v45 = vpop.f32.mrf.mxu2  ;;  %v483_v48 = vpop.f32.mrf.mxu0 }
  0xd4   : > { %v510_v46 = vadd.f32 %v509_v45, %v309_v44  ;;  %v523_v47 = vpop.f32.mrf.mxu3  ;;  %v484_v50 = vadd.f32 %v483_v48, %v308_v39  ;;  %v497_v52 = vpop.f32.mrf.mxu1 }
  0xd6   : > { %v524_v49 = vadd.f32 %v523_v47, %v510_v46  ;;  %v865_v54 = vpop.eup %864  ;;  %v498_v55 = vadd.f32 %v497_v52, %v484_v50 }
  0xd7   : > { %v538_v60 = vmul.f32 %v865_v54, %v534_v53 }
  0xd8   : > { %866 = vtanh.f32 %v524_v49 }
  0xd9   : > { %868 = vtanh.f32 %v498_v55 }
  0xdb   : > { %v511_v56 = vpop.f32.mrf.mxu2 }
  0xdc   : > { %v512_v58 = vadd.f32 %v511_v56, %v309_v44  ;;  %v525_v59 = vpop.f32.mrf.mxu3 }
  0xde   : > { %v867_v61 = vpop.eup %866  ;;  %v526_v62 = vadd.f32 %v525_v59, %v512_v58 }
  0xdf   : > { %v539_v63 = vmul.f32 %v867_v61, %v535_v57  ;;  %v869_v1 = vpop.eup %868 }
  0xe0   : > { %870 = vtanh.f32 %v526_v62  ;;  %v540_v3 = vmul.f32 %v869_v1, %v534_v53 }
  0xe1   : > { %v542_v0 = vadd.f32 %v539_v63, %v538_v60 }
  0xe3   : > { %543 = vadd.xlane.f32.xlu0 %v542_v0 }
  0xe6   : > { %v871_v2 = vpop.eup %870 }
  0xe7   : > { %v541_v4 = vmul.f32 %v871_v2, %v535_v57 }
  0xe9   : > { %v545_v5 = vadd.f32 %v541_v4, %v540_v3 }
  0xeb   : > { %546 = vadd.xlane.f32.xlu0 %v545_v5 }
 0x156   : > { %v544_v7 = vpop.xlane.xlu0 %543 }
 0x157   : > { %v550_v8 = vadd.f32 %v549_v6, %v544_v7 }
 0x159   : > { %553 = vst.msk [vmem:[%s266_s8] sm:$0xff] %vm552_vm0, %v550_v8 }
 0x15e   : > { %v547_v9 = vpop.xlane.xlu0 %546 }
 0x15f   : > { %v551_v10 = vadd.f32 %v549_v6, %v547_v9 }
 0x161   : > { %554 = vst.msk [vmem:[%s266_s8 + $0x8] sm:$0xff] %vm552_vm0, %v551_v10 }
 0x162 PF: > { %p17_p4 = scmp.ge.s32.totalorder %s1056_s7, 4   ;;  %s1138_s20 = smov %s962_s21 }
 0x163   : > { %s1139_s21 = smov %s966_s22  ;;  %s1140_s22 = smov %s1066_s12 }
 0x164   : > { %s1141_s23 = smov %s1056_s7  ;;  %19 = sbr.rel (!%p17_p4) target bundleno = 6 (0x6), region = 84 }
 0x169   :  { %577 = vsyncpa [#allocation4], 1 }
 0x16a   :  { %579 = vsyncpa [#allocation4 + $0x1], 1 }
 0x16b   :  { %580 = vsyncpa [#allocation6], 1 }

</bundles_post_ra>
